<compile_context>
chip_gen: v6e
topology: v6e:2x2x1
jax: 0.10.0
libtpu: 0.0.40
codegen_flags: <defaults>
</compile_context>

<pallas_src>
import functools

import jax
import jax.numpy as jnp
from jax import lax
from jax.experimental import pallas as pl
from jax.experimental.pallas import tpu as pltpu

ALPHA = 0.3
BETA = 0.3
GLOBAL_MIN_INIT = 100000.0


def _bias_loss_kernel(feat_ref, logits_ref, target_ref, out_ref,
                      sum_acc, sq_acc, *, inv_d, inv_dm1, inv_b, tile_d):
    # feat_ref:   (B, tile_d)  features tile (native dtype, upcast here)
    # logits_ref: (B, K)       classifier output (VMEM-resident, tiny)
    # target_ref: (B, 1) int32 class indices
    # out_ref:    (1, 1) f32   scalar loss
    # sum_acc/sq_acc: (B, 128) f32 lane-wide accumulators
    d_step = pl.program_id(0)

    @pl.when(d_step == 0)
    def _init():
        sum_acc[...] = jnp.zeros_like(sum_acc)
        sq_acc[...] = jnp.zeros_like(sq_acc)

    # ---- streamed single-pass accumulation (pure VALU; one HBM read/byte) ----
    feat = feat_ref[...].astype(jnp.float32)          # (B, tile_d)
    s = sum_acc[...]
    ss = sq_acc[...]
    for c in range(tile_d // 128):                    # static unroll, 128-lane chunks
        blk = feat[:, c * 128:(c + 1) * 128]
        s = s + blk
        ss = ss + blk * blk
    sum_acc[...] = s
    sq_acc[...] = ss

    # ---- finalize: variance, normalisation, bias weights, CE, weighted mean ----
    @pl.when(d_step == pl.num_programs(0) - 1)
    def _finalize():
        row_sum = jnp.sum(sum_acc[...], axis=1, keepdims=True)   # (B, 1)  one XLU reduce
        row_sq = jnp.sum(sq_acc[...], axis=1, keepdims=True)     # (B, 1)
        # Unbiased variance: (sumsq - sum^2/D) / (D-1); 1/D and 1/(D-1) are
        # compile-time constants (exact f32), no runtime divide.
        var = (row_sq - row_sum * row_sum * inv_d) * inv_dm1     # (B, 1)

        vmin = jnp.min(var, axis=0, keepdims=True)               # (1, 1)
        vmax = jnp.max(var, axis=0, keepdims=True)               # (1, 1)
        gmin = jnp.minimum(vmin, GLOBAL_MIN_INIT)                # first-call semantics
        inv_range = pl.reciprocal(vmax - vmin, approx=True)      # EUP slot (free)
        var_norm = (var - gmin) * inv_range                      # (B, 1)
        weights = jnp.exp(var_norm * ALPHA) - BETA               # (B, 1)

        # per-sample cross entropy: logsumexp(logits) - logits[target]
        logits = logits_ref[...].astype(jnp.float32)             # (B, K)
        m = jnp.max(logits, axis=1, keepdims=True)
        lse = m + jnp.log(jnp.sum(jnp.exp(logits - m), axis=1, keepdims=True))
        tgt = target_ref[...]                                    # (B, 1) int32
        col = lax.broadcasted_iota(jnp.int32, logits.shape, 1)   # (B, K)
        tgt_logit = jnp.sum(jnp.where(col == tgt, logits, 0.0),
                            axis=1, keepdims=True)               # (B, 1)
        ce = lse - tgt_logit                                     # (B, 1)

        out_ref[...] = jnp.sum(weights * ce, axis=0, keepdims=True) * inv_b


def bias_loss(features, output, target, *, tile_d=512):
    """features: (B, C, H, W) f32/bf16, output: (B, K) logits, target: (B,) int."""
    assert tile_d % 128 == 0
    B = features.shape[0]
    feat2d = jnp.reshape(features, (B, -1))          # native dtype; kernel upcasts
    D = feat2d.shape[1]

    # Tile width (multiple of 128); pad D with zeros so it divides evenly.
    # Zero padding does not perturb sum / sum-of-squares; true D is baked in.
    tile = min(tile_d, -(-D // 128) * 128)
    d_pad = -(-D // tile) * tile
    if d_pad != D:
        feat2d = jnp.pad(feat2d, ((0, 0), (0, d_pad - D)))
    num_tiles = d_pad // tile

    tgt2d = target.astype(jnp.int32).reshape(B, 1)

    kernel = functools.partial(
        _bias_loss_kernel,
        inv_d=1.0 / D,
        inv_dm1=1.0 / max(D - 1, 1),   # D==1 is degenerate (torch would NaN too)
        inv_b=1.0 / B,
        tile_d=tile,
    )

    out = pl.pallas_call(
        kernel,
        out_shape=jax.ShapeDtypeStruct((1, 1), jnp.float32),
        grid_spec=pltpu.PrefetchScalarGridSpec(
            num_scalar_prefetch=0,
            grid=(num_tiles,),
            in_specs=[
                pl.BlockSpec((B, tile), lambda d: (0, d)),        # streamed features
                pl.BlockSpec(output.shape, lambda d: (0, 0)),     # tiny, resident
                pl.BlockSpec((B, 1), lambda d: (0, 0)),           # tiny, resident
            ],
            out_specs=pl.BlockSpec((1, 1), lambda d: (0, 0)),
            scratch_shapes=[
                pltpu.VMEM((B, 128), jnp.float32),   # running sum
                pltpu.VMEM((B, 128), jnp.float32),   # running sum of squares
            ],
        ),
        compiler_params=pltpu.CompilerParams(
            dimension_semantics=("arbitrary",),       # reduction axis
            vmem_limit_bytes=32 * 1024 * 1024,        # safe on v5e/v6e/v7x
        ),
    )(feat2d, output, tgt2d)
    return out[0, 0]


def bias_loss_ref(features, output, target):
    """Pure-JAX reference mirroring the PyTorch module (first call)."""
    B = features.shape[0]
    f = jnp.reshape(features, (B, -1)).astype(jnp.float32)
    var = jnp.var(f, axis=1, ddof=1)
    gmin = jnp.minimum(jnp.min(var), GLOBAL_MIN_INIT)
    var_n = (var - gmin) / (jnp.max(var) - jnp.min(var))
    weights = jnp.exp(var_n * ALPHA) - BETA
    logits = output.astype(jnp.float32)
    lse = jax.scipy.special.logsumexp(logits, axis=1)
    ce = lse - jnp.take_along_axis(
        logits, target[:, None].astype(jnp.int32), axis=1)[:, 0]
    return jnp.mean(weights * ce)


if __name__ == "__main__":
    key = jax.random.PRNGKey(0)
    kf, ko, kt = jax.random.split(key, 3)

    B, C, H, W = 2, 4, 16, 16
    K = 10  # number of classes

    scale = jnp.arange(1, B + 1, dtype=jnp.float32).reshape(B, 1, 1, 1)
    features = jax.random.normal(kf, (B, C, H, W), dtype=jnp.float32) * scale
    output = jax.random.normal(ko, (B, K), dtype=jnp.float32)
    target = jax.random.randint(kt, (B,), 0, K, dtype=jnp.int32)

    loss = jax.block_until_ready(bias_loss(features, output, target))
    ref = jax.block_until_ready(bias_loss_ref(features, output, target))

    assert jnp.isfinite(loss), "loss is not finite"
    # Tolerance covers single-pass variance and the EUP approximate reciprocal.
    assert jnp.allclose(loss, ref, rtol=2e-3, atol=1e-5), (loss, ref)
    print("KERNEL_OK")
</pallas_src>

<mosaic_0001>
module attributes {stable_mosaic.version = 11 : i64} {
  func.func @_bias_loss_kernel(%arg0: i32, %arg1: memref<2x512xf32, #tpu.memory_space<vmem>>, %arg2: memref<2x10xf32, #tpu.memory_space<vmem>>, %arg3: memref<2x1xi32, #tpu.memory_space<vmem>>, %arg4: memref<1x1xf32, #tpu.memory_space<vmem>>, %arg5: memref<2x128xf32, #tpu.memory_space<vmem>>, %arg6: memref<2x128xf32, #tpu.memory_space<vmem>>) attributes {dimension_semantics = [#tpu.dimension_semantics<arbitrary>], iteration_bounds = array<i64: 2>, scalar_prefetch = 0 : i64, scratch_operands = 2 : i64, tpu.core_type = #tpu.core_type<tc>, window_params = [{transform_indices = @transform_0, window_bounds = array<i64: 2, 512>}, {pipeline_mode = #tpu.pipeline_mode<synchronous>, transform_indices = @transform_1, window_bounds = array<i64: 2, 10>}, {pipeline_mode = #tpu.pipeline_mode<synchronous>, transform_indices = @transform_2, window_bounds = array<i64: 2, 1>}, {pipeline_mode = #tpu.pipeline_mode<synchronous>, transform_indices = @transform_3, window_bounds = array<i64: 1, 1>}]} {
    %c0_i32 = arith.constant 0 : i32
    %0 = arith.cmpi eq, %arg0, %c0_i32 : i32
    %1 = arith.extui %0 : i1 to i32
    %c0_i32_0 = arith.constant 0 : i32
    %2 = arith.cmpi ne, %1, %c0_i32_0 : i32
    scf.if %2 {
      %cst = arith.constant 0.000000e+00 : f32
      %27 = vector.broadcast %cst : f32 to vector<2x128xf32>
      %c0_11 = arith.constant 0 : index
      %c0_12 = arith.constant 0 : index
      %28 = vector.load %arg5[%c0_11, %c0_12] : memref<2x128xf32, #tpu.memory_space<vmem>>, vector<2x128xf32>
      tpu.vector_store %arg5[%c0_11, %c0_12], %27 {strides = array<i32>} : memref<2x128xf32, #tpu.memory_space<vmem>>, vector<2x128xf32>,
      %cst_13 = arith.constant 0.000000e+00 : f32
      %29 = vector.broadcast %cst_13 : f32 to vector<2x128xf32>
      %c0_14 = arith.constant 0 : index
      %c0_15 = arith.constant 0 : index
      %30 = vector.load %arg6[%c0_14, %c0_15] : memref<2x128xf32, #tpu.memory_space<vmem>>, vector<2x128xf32>
      tpu.vector_store %arg6[%c0_14, %c0_15], %29 {strides = array<i32>} : memref<2x128xf32, #tpu.memory_space<vmem>>, vector<2x128xf32>,
    } else {
    }
    %c0 = arith.constant 0 : index
    %c0_1 = arith.constant 0 : index
    %3 = vector.load %arg1[%c0, %c0_1] : memref<2x512xf32, #tpu.memory_space<vmem>>, vector<2x512xf32>
    %c0_2 = arith.constant 0 : index
    %c0_3 = arith.constant 0 : index
    %4 = vector.load %arg5[%c0_2, %c0_3] : memref<2x128xf32, #tpu.memory_space<vmem>>, vector<2x128xf32>
    %c0_4 = arith.constant 0 : index
    %c0_5 = arith.constant 0 : index
    %5 = vector.load %arg6[%c0_4, %c0_5] : memref<2x128xf32, #tpu.memory_space<vmem>>, vector<2x128xf32>
    %6 = vector.extract_strided_slice %3 {offsets = [0, 0], sizes = [2, 128], strides = [1, 1]} : vector<2x512xf32> to vector<2x128xf32>
    %7 = arith.addf %4, %6 : vector<2x128xf32>
    %8 = arith.mulf %6, %6 : vector<2x128xf32>
    %9 = arith.addf %5, %8 : vector<2x128xf32>
    %10 = vector.extract_strided_slice %3 {offsets = [0, 128], sizes = [2, 128], strides = [1, 1]} : vector<2x512xf32> to vector<2x128xf32>
    %11 = arith.addf %7, %10 : vector<2x128xf32>
    %12 = arith.mulf %10, %10 : vector<2x128xf32>
    %13 = arith.addf %9, %12 : vector<2x128xf32>
    %14 = vector.extract_strided_slice %3 {offsets = [0, 256], sizes = [2, 128], strides = [1, 1]} : vector<2x512xf32> to vector<2x128xf32>
    %15 = arith.addf %11, %14 : vector<2x128xf32>
    %16 = arith.mulf %14, %14 : vector<2x128xf32>
    %17 = arith.addf %13, %16 : vector<2x128xf32>
    %18 = vector.extract_strided_slice %3 {offsets = [0, 384], sizes = [2, 128], strides = [1, 1]} : vector<2x512xf32> to vector<2x128xf32>
    %19 = arith.addf %15, %18 : vector<2x128xf32>
    %20 = arith.mulf %18, %18 : vector<2x128xf32>
    %21 = arith.addf %17, %20 : vector<2x128xf32>
    %c0_6 = arith.constant 0 : index
    %c0_7 = arith.constant 0 : index
    %22 = vector.load %arg5[%c0_6, %c0_7] : memref<2x128xf32, #tpu.memory_space<vmem>>, vector<2x128xf32>
    tpu.vector_store %arg5[%c0_6, %c0_7], %19 {strides = array<i32>} : memref<2x128xf32, #tpu.memory_space<vmem>>, vector<2x128xf32>,
    %c0_8 = arith.constant 0 : index
    %c0_9 = arith.constant 0 : index
    %23 = vector.load %arg6[%c0_8, %c0_9] : memref<2x128xf32, #tpu.memory_space<vmem>>, vector<2x128xf32>
    tpu.vector_store %arg6[%c0_8, %c0_9], %21 {strides = array<i32>} : memref<2x128xf32, #tpu.memory_space<vmem>>, vector<2x128xf32>,
    %c1_i32 = arith.constant 1 : i32
    %24 = arith.cmpi eq, %arg0, %c1_i32 : i32
    %25 = arith.extui %24 : i1 to i32
    %c0_i32_10 = arith.constant 0 : i32
    %26 = arith.cmpi ne, %25, %c0_i32_10 : i32
    scf.if %26 {
      %c0_11 = arith.constant 0 : index
      %c0_12 = arith.constant 0 : index
      %27 = vector.load %arg5[%c0_11, %c0_12] : memref<2x128xf32, #tpu.memory_space<vmem>>, vector<2x128xf32>
      %cst = arith.constant dense<0.000000e+00> : vector<2xf32>
      %28 = vector.multi_reduction <add>, %27, %cst [1] : vector<2x128xf32> to vector<2xf32>
      %29 = vector.shape_cast %28 : vector<2xf32> to vector<2x1xf32>
      %c0_13 = arith.constant 0 : index
      %c0_14 = arith.constant 0 : index
      %30 = vector.load %arg6[%c0_13, %c0_14] : memref<2x128xf32, #tpu.memory_space<vmem>>, vector<2x128xf32>
      %cst_15 = arith.constant dense<0.000000e+00> : vector<2xf32>
      %31 = vector.multi_reduction <add>, %30, %cst_15 [1] : vector<2x128xf32> to vector<2xf32>
      %32 = vector.shape_cast %31 : vector<2xf32> to vector<2x1xf32>
      %33 = arith.mulf %29, %29 : vector<2x1xf32>
      %cst_16 = arith.constant 9.765625E-4 : f32
      %34 = vector.broadcast %cst_16 : f32 to vector<2x1xf32>
      %35 = arith.mulf %33, %34 : vector<2x1xf32>
      %36 = arith.subf %32, %35 : vector<2x1xf32>
      %cst_17 = arith.constant 9.77517105E-4 : f32
      %37 = vector.broadcast %cst_17 : f32 to vector<2x1xf32>
      %38 = arith.mulf %36, %37 : vector<2x1xf32>
      %cst_18 = arith.constant dense<0x7F800000> : vector<1xf32>
      %39 = vector.multi_reduction <minimumf>, %38, %cst_18 [0] : vector<2x1xf32> to vector<1xf32>
      %40 = vector.shape_cast %39 : vector<1xf32> to vector<1x1xf32>
      %cst_19 = arith.constant dense<0xFF800000> : vector<1xf32>
      %41 = vector.multi_reduction <maximumf>, %38, %cst_19 [0] : vector<2x1xf32> to vector<1xf32>
      %42 = vector.shape_cast %41 : vector<1xf32> to vector<1x1xf32>
      %cst_20 = arith.constant 1.000000e+05 : f32
      %43 = vector.broadcast %cst_20 : f32 to vector<1x1xf32>
      %44 = arith.minimumf %40, %43 : vector<1x1xf32>
      %45 = arith.subf %42, %40 : vector<1x1xf32>
      %46 = tpu.reciprocal %45 {approx = true} : vector<1x1xf32> -> vector<1x1xf32>
      %47 = vector.broadcast %44 : vector<1x1xf32> to vector<2x1xf32>
      %48 = arith.subf %38, %47 : vector<2x1xf32>
      %49 = vector.broadcast %46 : vector<1x1xf32> to vector<2x1xf32>
      %50 = arith.mulf %48, %49 : vector<2x1xf32>
      %cst_21 = arith.constant 3.000000e-01 : f32
      %51 = vector.broadcast %cst_21 : f32 to vector<2x1xf32>
      %52 = arith.mulf %50, %51 : vector<2x1xf32>
      %53 = math.exp %52 : vector<2x1xf32>
      %cst_22 = arith.constant 3.000000e-01 : f32
      %54 = vector.broadcast %cst_22 : f32 to vector<2x1xf32>
      %55 = arith.subf %53, %54 : vector<2x1xf32>
      %c0_23 = arith.constant 0 : index
      %c0_24 = arith.constant 0 : index
      %56 = vector.load %arg2[%c0_23, %c0_24] : memref<2x10xf32, #tpu.memory_space<vmem>>, vector<2x10xf32>
      %cst_25 = arith.constant dense<0xFF800000> : vector<2xf32>
      %57 = vector.multi_reduction <maximumf>, %56, %cst_25 [1] : vector<2x10xf32> to vector<2xf32>
      %58 = vector.shape_cast %57 : vector<2xf32> to vector<2x1xf32>
      %59 = vector.broadcast %58 : vector<2x1xf32> to vector<2x10xf32>
      %60 = arith.subf %56, %59 : vector<2x10xf32>
      %61 = math.exp %60 : vector<2x10xf32>
      %cst_26 = arith.constant dense<0.000000e+00> : vector<2xf32>
      %62 = vector.multi_reduction <add>, %61, %cst_26 [1] : vector<2x10xf32> to vector<2xf32>
      %63 = vector.shape_cast %62 : vector<2xf32> to vector<2x1xf32>
      %64 = math.log %63 : vector<2x1xf32>
      %65 = arith.addf %58, %64 : vector<2x1xf32>
      %c0_27 = arith.constant 0 : index
      %c0_28 = arith.constant 0 : index
      %66 = vector.load %arg3[%c0_27, %c0_28] : memref<2x1xi32, #tpu.memory_space<vmem>>, vector<2x1xi32>
      %67 = tpu.iota {dimensions = array<i32: 1>} : vector<2x10xi32>
      %68 = vector.broadcast %66 : vector<2x1xi32> to vector<2x10xi32>
      %69 = arith.cmpi eq, %67, %68 : vector<2x10xi32>
      %cst_29 = arith.constant 0.000000e+00 : f32
      %70 = vector.broadcast %cst_29 : f32 to vector<2x10xf32>
      %71 = arith.select %69, %56, %70 : vector<2x10xi1>, vector<2x10xf32>
      %cst_30 = arith.constant dense<0.000000e+00> : vector<2xf32>
      %72 = vector.multi_reduction <add>, %71, %cst_30 [1] : vector<2x10xf32> to vector<2xf32>
      %73 = vector.shape_cast %72 : vector<2xf32> to vector<2x1xf32>
      %74 = arith.subf %65, %73 : vector<2x1xf32>
      %75 = arith.mulf %55, %74 : vector<2x1xf32>
      %cst_31 = arith.constant dense<0.000000e+00> : vector<1xf32>
      %76 = vector.multi_reduction <add>, %75, %cst_31 [0] : vector<2x1xf32> to vector<1xf32>
      %77 = vector.shape_cast %76 : vector<1xf32> to vector<1x1xf32>
      %cst_32 = arith.constant 5.000000e-01 : f32
      %78 = vector.broadcast %cst_32 : f32 to vector<1x1xf32>
      %79 = arith.mulf %77, %78 : vector<1x1xf32>
      %c0_33 = arith.constant 0 : index
      %c0_34 = arith.constant 0 : index
      %80 = vector.load %arg4[%c0_33, %c0_34] : memref<1x1xf32, #tpu.memory_space<vmem>>, vector<1x1xf32>
      tpu.vector_store %arg4[%c0_33, %c0_34], %79 {strides = array<i32>} : memref<1x1xf32, #tpu.memory_space<vmem>>, vector<1x1xf32>,
    } else {
    }
    return
  }
  func.func @transform_0(%arg0: i32) -> (i32, i32) {
    %c0_i32 = arith.constant 0 : i32
    %c0_i32_0 = arith.constant 0 : i32
    return %c0_i32, %arg0 : i32, i32
  }
  func.func @transform_1(%arg0: i32) -> (i32, i32) {
    %c0_i32 = arith.constant 0 : i32
    %c0_i32_0 = arith.constant 0 : i32
    %c0_i32_1 = arith.constant 0 : i32
    return %c0_i32, %c0_i32_0 : i32, i32
  }
  func.func @transform_2(%arg0: i32) -> (i32, i32) {
    %c0_i32 = arith.constant 0 : i32
    %c0_i32_0 = arith.constant 0 : i32
    %c0_i32_1 = arith.constant 0 : i32
    return %c0_i32, %c0_i32_0 : i32, i32
  }
  func.func @transform_3(%arg0: i32) -> (i32, i32) {
    %c0_i32 = arith.constant 0 : i32
    %c0_i32_0 = arith.constant 0 : i32
    %c0_i32_1 = arith.constant 0 : i32
    return %c0_i32, %c0_i32_0 : i32, i32
  }
}

</mosaic_0001>

<bundles_post_ra>
// kernel: tpu_custom_call.1
= control target key start
LH: loop header
LB: loop body
LE: loop exit
PB: predicated region body
PF: predicated region fallthrough
CT: control target
= control target key end

     0   :  { %8 = vsyncpa [#allocation5], 0  ;;  %s675_s0 = inlined_call_operand.hbm [shape: f32[2,1024], index: 0, kind: input, shape index: {}]   ;;  %s676_s1 = inlined_call_operand.vmem [shape: f32[2,10], index: 1, kind: input, shape index: {}]   ;;  %s677_s2 = inlined_call_operand.vmem [shape: s32[2,1], index: 2, kind: input, shape index: {}]   ;;  %s678_s3 = inlined_call_operand.hbm [shape: f32[1,1], index: 3, kind: output, shape index: {}]  }
   0x1   :  { %10 = vsyncpa [#allocation5 + $0x1], 0 }
   0x2   :  { %11 = vsyncpa [#allocation6], 0  ;;  %s552_s12 = smov 0   ;;  %s554_s13 = smov 0  }
   0x3   :  { %s556_s14 = smov 0   ;;  %s558_s15 = smov 0  }
   0x4 LB: > { %s571_s16 = sadd.s32 4294967295, %s525_s15   ;;  %s574_s17 = sadd.s32 1, %s525_s15   ;;  %s525_s15 = sphi %s558_s15, %s688_s15   ;;  %s521_s14 = sphi %s556_s14, %s687_s14   ;;  %s517_s13 = sphi %s554_s13, %s686_s13   ;;  %s513_s12 = sphi %s552_s12, %s685_s12  }
   0x5   : > { %s21_s18 = ssub.s32 %s525_s15, %s574_s17  ;;  %s24_s19 = sadd.s32 1, %s521_s14 }
   0x6   : > { %p22_p0 = scmp.eq.s32.totalorder %s21_s18, 0  ;;  %p31_p1 = scmp.ne.s32.totalorder %s521_s14, %s517_s13 }
   0x7   : > { %p32_p2 = scmp.eq.s32.totalorder %s525_s15, 0  ;;  %p37_p3 = scmp.ne.s32.totalorder %s517_s13, %s513_s12 }
   0x8   : > { %s584_s20 = scalar_select %p22_p0, %s521_s14, %s24_s19  }
   0x9   : > { %p33_p4 = por %p32_p2, %p31_p1  ;;  %p38_p5 = scmp.eq.s32.totalorder %s571_s16, 0 }
   0xa   : > { %p386_p6 = scmp.lt.s32.totalorder %s525_s15, 2  ;;  %s130_s22 = sand.u32 1, %s521_s14  }
   0xb   : > { %p588_p7 = por %p38_p5, %p37_p3  ;;  %s363_s23 = sshll.u32 %s130_s22, 3 }
   0xc   : > { %s375_s24 = sshll.u32 %s525_s15, 7  ;;  %s134_s28 = scalar_lea.vmem [#allocation4], %s363_s23 }
   0xd   : > { %s680_s21 = scalar_select %p588_p7, 1, 0 }
   0xe   : > { %s597_s27 = scalar_lea.hbm %s675_s0, %s375_s24  ;;  %s142_s29 = sshll.u32 %s134_s28, 4  ;;  %s599_s29 = int_to_ptr.vmem [resolvable:$true] %s142_s29 }
   0xf   : > { %p601_p8 = pnand %p386_p6, %p33_p4  ;;  %s131_s4 = scalar_lea.sflag [#allocation5], %s130_s22 }
  0x10   : > { %s435_s5 = scalar_lea.hbm %s597_s27, 128  ;;  %s440_s8 = scalar_lea.hbm %s675_s0, 256 }
  0x11   : > { %p436_p11 = scmp.ne.s32.totalorder %s597_s27, %s435_s5  ;;  %p437_p12 = pneg %p601_p8 }
  0x12   : > { %p441_p1 = scmp.lt.s32.totalorder %s597_s27, %s675_s0  ;;  %p442_p2 = scmp.lt.s32.totalorder %s440_s8, %s435_s5 }
  0x13   : > { %p438_p13 = pnand %p437_p12, %p436_p11 }
  0x14   : > { %p443_p3 = por %p442_p2, %p441_p1 }
  0x15   : > { %p439_p0 = pneg %p438_p13 }
  0x17   : > { %p444_p4 = pnand %p443_p3, %p439_p0 }
  0x19   : > { %447 = shalt.err (!%p444_p4)
}
  0x1a   : > { %s448_s11 = scalar_lea.vmem %s599_s29, 128  ;;  %s527_s12 = smov [#allocation4]  }
  0x1b   : > { %p449_p5 = scmp.ne.s32.totalorder %s599_s29, %s448_s11  ;;  %s453_s18 = sshll.u32 %s527_s12, 4  ;;  %s454_s18 = int_to_ptr.vmem [resolvable:$false] %s453_s18 }
  0x1c   : > { %s455_s19 = scalar_lea.vmem %s454_s18, 256  ;;  %p456_p13 = scmp.lt.s32.totalorder %s599_s29, %s454_s18 }
  0x1d   : > { %p451_p6 = pnand %p449_p5, %p437_p12  ;;  %p457_p9 = scmp.lt.s32.totalorder %s455_s19, %s448_s11 }
  0x1f   : > { %p452_p11 = pneg %p451_p6  ;;  %p458_p10 = por %p457_p9, %p456_p13 }
  0x21   : > { %p459_p7 = pnand %p458_p10, %p452_p11 }
  0x23   : > { %462 = shalt.err (!%p459_p7)
}
  0x24   : > { %385 = dma.hbm_to_vmem [thread:$0]  (!%p601_p8), %s597_s27, 128, %s599_s29, %s131_s4  }
  0x25   : > { %p682_p0 = scmp.lt.s32.totalorder %s525_s15, 3  ;;  %p683_p1 = scmp.ge.s32.totalorder %s525_s15, 1 }
  0x27   : > { %p148_p12 = pnand %p683_p1, %p682_p0 }
  0x28   : > { %s153_s22 = sand.u32 (!%p148_p12), 1, %s517_s13   ;;  %p684_p9 = scmp.ne.s32.totalorder (!%p148_p12), %s680_s21, 0 }
  0x29   : > { %151 = sbr.rel (%p148_p12) target bundleno = 424 (0x1a8), region = 32  ;;  %s367_s23 = sshll.u32 (!%p148_p12), %s153_s22, 3 }
  0x2a   : > { %s154_s24 = scalar_lea.sflag (!%p148_p12), [#allocation5], %s153_s22  ;;  %s157_s25 = scalar_lea.vmem (!%p148_p12), [#allocation4], %s367_s23 }
  0x2e   : > { %504 = dma.done.wait (%p684_p9), %s154_s24, 128  }
  0x2f   : > { %506 = vsyncadd (%p684_p9), %s154_s24, 4294967168  ;;  %p368_p7 = scmp.ne.s32.totalorder %s571_s16, 0 }
  0x31   : > { %179 = sbr.rel (%p368_p7) target bundleno = 56 (0x38), region = 40 }
  0x36   : > { %v528_v0 = vmov 0.0  }
  0x37   : > { %180 = vst [vmem:[#allocation2] sm:$0x3] %v528_v0  ;;  %181 = vst [vmem:[#allocation3] sm:$0x3] %v528_v0 }
  0x38 PF: > { %v182_v1 = vld [vmem:[%s157_s25] sm:$0xff]  ;;  %v192_v2 = vlaneseq  ;;  %v529_v3 = vmov 1983009808   ;;  %p369_p8 = scmp.ne.s32.totalorder %s571_s16, 1 }
  0x39   : > { %v190_v4 = vunpack.c.l.s4 %v529_v3  ;;  %v186_v6 = vmul.f32 %v182_v1, %v182_v1  ;;  %v199_v8 = vrot.slane %v182_v1, 2  ;;  %v213_v9 = vrot.slane %v182_v1, 4 }
  0x3a   : > { %v193_v7 = vshrl.u32 %v192_v2, 7  ;;  %v220_v10 = vrot.slane %v182_v1, 6  ;;  %v203_v12 = vcombine.high %v182_v1, %v182_v1 }
  0x3b   : > { %v191_v11 = vunpack.c.0.s8 %v190_v4  ;;  %v201_v15 = vmul.f32 %v199_v8, %v199_v8  ;;  %v215_v16 = vmul.f32 %v213_v9, %v213_v9 }
  0x3c   : > { %v222_v19 = vmul.f32 %v220_v10, %v220_v10 }
  0x3d   : > { %v194_v17 = vsub.s32 %v191_v11, %v193_v7 }
  0x3e   : > { %v184_v5 = vld [vmem:[#allocation3] sm:$0x3]  ;;  %v183_v14 = vld [vmem:[#allocation2] sm:$0x3] }
  0x3f   : > { %v187_v13 = vadd.f32 %v186_v6, %v184_v5  ;;  %v185_v20 = vadd.f32 %v183_v14, %v182_v1  ;;  %v195_v21 = vrot.slane %v182_v1, %v194_v17  ;;  %v210_v22 = vrot.slane %v203_v12, %v194_v17 }
  0x41   : > { %v202_v18 = vadd.f32 %v201_v15, %v187_v13  ;;  %v196_v24 = vcombine.high %v195_v21, %v195_v21  ;;  %v217_v27 = vcombine.high %v210_v22, %v210_v22 }
  0x43   : > { %v216_v23 = vadd.f32 %v215_v16, %v202_v18  ;;  %v198_v26 = vadd.f32 %v196_v24, %v185_v20 }
  0x45   : > { %v223_v25 = vadd.f32 %v222_v19, %v216_v23  ;;  %v212_v28 = vadd.f32 %v210_v22, %v198_v26  ;;  %229 = sbr.rel (%p369_p8) target bundleno = 409 (0x199), region = 44 }
  0x47   : > { %225 = vst [vmem:[#allocation3] sm:$0x3] %v223_v25  ;;  %v219_v29 = vadd.f32 %v217_v27, %v212_v28 }
  0x49   : > { %224 = vst [vmem:[#allocation2] sm:$0x3] %v219_v29 }
  0x4a   : > { %v266_v30 = vld [vmem:[%s676_s1] sm:$0x3]  ;;  %vm267_vm0 = vcmask 74752   ;;  %v530_v32 = vmov 0   ;;  %vm231_vm1 = vcmask 1041408   ;;  %v282_v41 = vand.u32 127, %v192_v2 }
  0x4b   : > { %v268_v31 = vsel %vm267_vm0, %v266_v30, -inf  ;;  %426 = vset.pattern.permute.xlu0 %v530_v32  ;;  %v280_v37 = vld [vmem:[%s677_s2] sm:$0x3]  ;;  %vm301_vm3 = vcmask 0  }
  0x4c   : > { %269 = vmax.xlane.f32.xlu0 %v268_v31 }
  0x4e   : > { %v235_v34 = vld [vmem:[#allocation3] sm:$0x3] }
  0x4f   : > { %v236_v36 = vsel %vm231_vm1, %v235_v34, 0.0 }
  0x50   : > { %v230_v33 = vld [vmem:[#allocation2] sm:$0x3] }
  0x51   : > { %v232_v35 = vsel %vm231_vm1, %v230_v33, 0.0 }
  0x52   : > { %233 = vadd.xlane.f32.xlu1 %v232_v35 }
  0x56   : > { %237 = vadd.xlane.f32.xlu1 %v236_v36 }
  0x62   : > { %284 = vperm.xlu0 %426, %v280_v37  }
  0xd5   : > { %v270_v38 = vpop.xlane.xlu0 %269 }
  0xd6   : > { %v271_v39 = vsub.f32 %v266_v30, %v270_v38 }
  0xd8   : > { %v272_v40 = vmul.f32 1.442695, %v271_v39 }
  0xda   : > { %427 = vpow2.f32 %v272_v40 }
  0xdb   : > { %v234_v47 = vpop.xlane.xlu1 %233 }
  0xdc   : > { %v239_v48 = vmul.f32 %v234_v47, %v234_v47 }
  0xdd   : > { %v285_v42 = vpop.permute.xlu0 %284 }
  0xde   : > { %vm286_vm2 = vcmp.eq.s32.totalorder %v282_v41, %v285_v42  ;;  %v240_v49 = vmul.f32 0.0009765625, %v239_v48 }
  0xdf   : > { %v287_v44 = vsel %vm286_vm2, %v266_v30, 0.0  ;;  %v238_v50 = vpop.xlane.xlu1 %237 }
  0xe0   : > { %v288_v46 = vsel %vm267_vm0, %v287_v44, 0.0  ;;  %v241_v51 = vsub.f32 %v238_v50, %v240_v49 }
  0xe2   : > { %v242_v52 = vmul.f32 0.0009775171, %v241_v51 }
  0xe4   : > { %v243_v53 = vsel %vm231_vm1, %v242_v52, inf  ;;  %v250_v54 = vsel %vm231_vm1, %v242_v52, -inf }
  0xe5   : > { %v244_v55 = vrot.slane %v243_v53, 4  ;;  %v251_v56 = vrot.slane %v250_v54, 4 }
  0xe7   : > { %v428_v43 = vpop.eup %427  ;;  %v245_v57 = vmin.f32 %v243_v53, %v244_v55  ;;  %v252_v58 = vmax.f32 %v250_v54, %v251_v56 }
  0xe8   : > { %v274_v45 = vsel %vm267_vm0, %v428_v43, 0.0 }
  0xe9   : > { %275 = vadd.xlane.f32.xlu1 %v274_v45  ;;  %v246_v59 = vrot.slane %v245_v57, 2  ;;  %v253_v60 = vrot.slane %v252_v58, 2 }
  0xeb   : > { %v247_v61 = vmin.f32 %v245_v57, %v246_v59  ;;  %v254_v62 = vmax.f32 %v252_v58, %v253_v60 }
  0xed   : > { %289 = vadd.xlane.f32.xlu1 %v288_v46  ;;  %v248_v63 = vrot.slane %v247_v61, 1  ;;  %v255_v0 = vrot.slane %v254_v62, 1 }
  0xef   : > { %v249_v1 = vmin.f32 %v247_v61, %v248_v63  ;;  %v256_v2 = vmax.f32 %v254_v62, %v255_v0 }
  0xf1   : > { %v258_v3 = vsub.f32 %v256_v2, %v249_v1  ;;  %v257_v4 = vmin.f32 %v249_v1, 100000.0 }
  0xf3   : > { %429 = vrcp.f32 %v258_v3  ;;  %v260_v5 = vsub.f32 %v242_v52, %v257_v4 }
 0x100   : > { %v430_v6 = vpop.eup %429 }
 0x101   : > { %v261_v7 = vmul.f32 %v430_v6, %v260_v5 }
 0x103   : > { %v262_v8 = vmul.f32 0.3, %v261_v7 }
 0x105   : > { %v263_v9 = vmul.f32 1.442695, %v262_v8 }
 0x172   : > { %v276_v10 = vpop.xlane.xlu1 %275 }
 0x173   : > { %431 = vlog2.f32 %v276_v10 }
 0x174   : > { %433 = vpow2.f32 %v263_v9 }
 0x176   : > { %v290_v14 = vpop.xlane.xlu1 %289 }
 0x180   : > { %v432_v11 = vpop.eup %431 }
 0x181   : > { %v278_v12 = vmul.f32 0.6931472, %v432_v11  ;;  %v434_v13 = vpop.eup %433 }
 0x182   : > { %v370_v16 = vadd.f32 -0.3, %v434_v13 }
 0x183   : > { %v279_v15 = vadd.f32 %v278_v12, %v270_v38 }
 0x185   : > { %v291_v17 = vsub.f32 %v279_v15, %v290_v14 }
 0x187   : > { %v292_v18 = vmul.f32 %v370_v16, %v291_v17 }
 0x189   : > { %v293_v19 = vsel %vm231_vm1, %v292_v18, 0.0 }
 0x18a   : > { %v294_v20 = vrot.slane %v293_v19, 4 }
 0x18c   : > { %v295_v21 = vadd.f32 %v294_v20, %v293_v19 }
 0x18e   : > { %v296_v22 = vrot.slane %v295_v21, 2 }
 0x190   : > { %v297_v23 = vadd.f32 %v296_v22, %v295_v21 }
 0x192   : > { %v298_v24 = vrot.slane %v297_v23, 1 }
 0x194   : > { %v299_v25 = vadd.f32 %v298_v24, %v297_v23 }
 0x196   : > { %v300_v26 = vmul.f32 0.5, %v299_v25 }
 0x198   : > { %302 = vst.msk [vmem:[#allocation7] sm:$0x1] %vm301_vm3, %v300_v26 }
 0x199 PF: > { %p387_p10 = scmp.eq.s32.totalorder %s571_s16, 1  ;;  %s531_s28 = smov [#allocation7]  }
 0x19a   : > { %s310_s29 = sshll.u32 %s531_s28, 4  ;;  %s311_s29 = int_to_ptr.vmem [resolvable:$true] %s310_s29 }
 0x19b   : > { %s463_s30 = scalar_lea.vmem %s311_s29, 16  ;;  %s469_s4 = scalar_lea.vmem %s311_s29, 32 }
 0x19c   : > { %p464_p2 = scmp.ne.s32.totalorder %s311_s29, %s463_s30  ;;  %p470_p5 = scmp.lt.s32.totalorder %s311_s29, %s311_s29 }
 0x19d   : > { %p471_p6 = scmp.lt.s32.totalorder %s469_s4, %s463_s30 }
 0x19e   : > { %p465_p3 = pnand %p464_p2, %p387_p10 }
 0x19f   : > { %p472_p11 = por %p471_p6, %p470_p5 }
 0x1a0   : > { %p466_p4 = pneg %p465_p3 }
 0x1a2   : > { %p473_p13 = pnand %p472_p11, %p466_p4 }
 0x1a4   : > { %476 = shalt.err (!%p473_p13)
}
 0x1a5   : > { %379 = dma.vmem_to_hbm [thread:$0]  (%p387_p10), %s311_s29, 16, %s678_s3, [#allocation6]  }
 0x1a6   : > { %508 = dma.done.wait (%p387_p10), [#allocation6], 16  }
 0x1a7   : > { %510 = vsyncadd (%p387_p10), [#allocation6], 4294967280 }
 0x1a8 PF: > { %p14_p0 = scmp.ge.s32.totalorder %s574_s17, 4   ;;  %s685_s12 = smov %s517_s13 }
 0x1a9   : > { %s686_s13 = smov %s521_s14  ;;  %s687_s14 = smov %s584_s20 }
 0x1aa   : > { %s688_s15 = smov %s574_s17  ;;  %16 = sbr.rel (!%p14_p0) target bundleno = 4 (0x4), region = 77 }
 0x1af   :  { %323 = vsyncpa [#allocation5], 1 }
 0x1b0   :  { %325 = vsyncpa [#allocation5 + $0x1], 1 }
 0x1b1   :  { %326 = vsyncpa [#allocation6], 1 }
 0x1b2   :  { %328 = vsyncpa [#allocation6 + $0x1], 1 }

</bundles_post_ra>
